<compile_context>
chip_gen: v5e
topology: v5e:2x2
jax: 0.10.0
libtpu: 0.0.40
codegen_flags: <defaults>
</compile_context>

<pallas_src>
import functools

import jax
import jax.numpy as jnp
from jax.experimental import pallas as pl
from jax.experimental.pallas import tpu as pltpu


def _xception_kernel(x_ref, w1_ref, b1_ref, wdw_ref, b2_ref,
                     mtop_ref, mbot_ref, o_ref, *, C_out):
    # x_ref    : (Bt*H, W*C_in)   input rows, lane axis = fused (w, c_in)
    # w1_ref   : (W*C_in, W*C_out) block-diagonal 1x1-conv weight
    # b1_ref   : (1, W*C_out)     1x1-conv bias, tiled across W
    # wdw_ref  : (9, W*C_out)     3x3 depthwise taps (k = kh*3 + kw), tiled across W,
    #                             with the left/right zero-padding folded in
    # b2_ref   : (1, W*C_out)     depthwise-conv bias, tiled across W
    # mtop_ref : (Bt*H, W*C_out)  0/1 mask, 0 on rows with h == 0
    # mbot_ref : (Bt*H, W*C_out)  0/1 mask, 0 on rows with h == H-1
    # o_ref    : (Bt*H, W*C_out)  output rows, lane axis = fused (w, c_out)
    rows = o_ref.shape[0]
    L = o_ref.shape[1]

    # ---- layer 1: 1x1 pointwise conv == one lane-dense MXU matmul ----
    y = jnp.dot(x_ref[...], w1_ref[...],
                preferred_element_type=jnp.float32) + b1_ref[...]

    # ---- layer 2: 3x3 depthwise conv, stride 1, zero padding 1 ----
    # H shifts: two sublane rolls, masked by the precomputed row masks (this also
    # kills leakage across the Bt images stacked inside one block).
    y_up = pltpu.roll(y, shift=1, axis=0) * mtop_ref[...]          # y[h-1, :]
    y_dn = pltpu.roll(y, shift=rows - 1, axis=0) * mbot_ref[...]   # y[h+1, :]

    wdw = wdw_ref[...]                                             # (9, L), k = kh*3 + kw
    # Column sums over kh.  The taps are applied BEFORE the lane roll; the
    # wrapper zeroed the kw=0 taps at w==W-1 and the kw=2 taps at w==0, so the
    # single lane that wraps around below contributes exactly zero.
    s_left = (y_up * wdw[0][None, :] + y * wdw[3][None, :] + y_dn * wdw[6][None, :])
    s_mid = (y_up * wdw[1][None, :] + y * wdw[4][None, :] + y_dn * wdw[7][None, :])
    s_right = (y_up * wdw[2][None, :] + y * wdw[5][None, :] + y_dn * wdw[8][None, :])

    # W shifts: two lane rolls by +/-C_out (XLU slot; only 4 rolls total now).
    acc = (s_mid
           + pltpu.roll(s_left, shift=C_out, axis=1)
           + pltpu.roll(s_right, shift=L - C_out, axis=1))

    o_ref[...] = (acc + b2_ref[...]).astype(o_ref.dtype)


def pack_xception_params(conv1_w, conv1_b, conv2_w, conv2_b, *, W, dtype=jnp.float32):
    """One-time packing of PyTorch-layout conv params into the fused-lane layout.

    Call once per parameter set and reuse the result across forward calls
    (hoists the kron/tile/transpose work out of the hot path).
    """
    C_out = conv1_w.shape[0]
    C_in = conv1_w.shape[1]
    L_out = W * C_out

    # 1x1 conv as a block-diagonal matmul over the fused (w, c) lane axis.
    w1 = conv1_w.reshape(C_out, C_in).T.astype(dtype)                # (C_in, C_out)
    w1_blk = jnp.kron(jnp.eye(W, dtype=dtype), w1)                   # (W*C_in, W*C_out)
    b1_t = jnp.tile(conv1_b.reshape(1, C_out), (1, W)).astype(dtype)

    # Depthwise taps: (C_out,1,3,3) -> (9, C_out) with k = kh*3 + kw, tiled across W.
    wdw = conv2_w.reshape(C_out, 3, 3).transpose(1, 2, 0).reshape(9, C_out)
    wdw_t = jnp.tile(wdw, (1, W)).astype(dtype)                      # (9, W*C_out)

    # Fold the left/right zero-padding into the taps.  The kernel multiplies the
    # taps BEFORE the lane roll, so the source lane whose rolled value would wrap
    # around the image edge must carry a zero weight:
    #   kw=0 taps (k in {0,3,6}): the w==W-1 source lane only feeds the wrap -> zero
    #   kw=2 taps (k in {2,5,8}): the w==0  source lane only feeds the wrap -> zero
    lane_w = jnp.arange(L_out) // C_out
    not_last = (lane_w != W - 1).astype(dtype)
    not_first = (lane_w != 0).astype(dtype)
    ones = jnp.ones((L_out,), dtype)
    lane_keep = jnp.stack([not_last, ones, not_first] * 3, axis=0)   # (9, L_out)
    wdw_t = wdw_t * lane_keep

    b2_t = jnp.tile(conv2_b.reshape(1, C_out), (1, W)).astype(dtype)
    return w1_blk, b1_t, wdw_t, b2_t


def _pick_block_batch(B, H, target_rows):
    """Largest divisor bt of B with bt*H <= target_rows.  If that leaves a
    single-step grid but a >=2-step grid is possible with >=128 rows per step,
    prefer the split so ("parallel",) can shard across v7x's two TensorCores."""
    divs = [d for d in range(1, B + 1) if B % d == 0]
    fit = [d for d in divs if d * H <= target_rows] or [1]
    bt = max(fit)
    if B // bt == 1:
        split = [d for d in fit if B // d >= 2 and d * H >= 128]
        if split:
            bt = max(split)
    return bt


def xception_forward_nhwc(x_nhwc, packed, *, target_rows=256):
    """Channel-last forward (no layout transposes).  `packed` comes from
    pack_xception_params.  target_rows ~256 suits v6e/v7x; use 128 on v5e."""
    w1_blk, b1_t, wdw_t, b2_t = packed
    B, H, W, C_in = x_nhwc.shape
    L_in = W * C_in
    L_out = b1_t.shape[1]
    C_out = L_out // W
    dtype = x_nhwc.dtype

    # Fold (W, C_in) into the lane axis: (B*H, W*C_in).
    x2d = x_nhwc.reshape(B * H, L_in)

    bt = _pick_block_batch(B, H, target_rows)
    rows = bt * H

    # Row masks killing the kh=0 / kh=2 taps at the top/bottom image rows (and at
    # image boundaries inside a block).  Pure jit-time constants, applied with a
    # single multiply in the kernel (no in-kernel iota / mod / compares).
    h_of_row = jnp.arange(rows) % H
    m_top = jnp.broadcast_to((h_of_row != 0).astype(dtype)[:, None], (rows, L_out))
    m_bot = jnp.broadcast_to((h_of_row != H - 1).astype(dtype)[:, None], (rows, L_out))

    kernel = functools.partial(_xception_kernel, C_out=C_out)

    # Per-step footprint (double-buffered) is a few hundred KiB at most here, far
    # below every generation's scoped VMEM default, so no Buffered()/vmem_limit
    # overrides are needed.
    out2d = pl.pallas_call(
        kernel,
        out_shape=jax.ShapeDtypeStruct((B * H, L_out), dtype),
        grid_spec=pltpu.PrefetchScalarGridSpec(
            num_scalar_prefetch=0,
            grid=(B // bt,),
            in_specs=[
                pl.BlockSpec((rows, L_in), lambda i: (i, 0)),
                pl.BlockSpec((L_in, L_out), lambda i: (0, 0)),
                pl.BlockSpec((1, L_out), lambda i: (0, 0)),
                pl.BlockSpec((9, L_out), lambda i: (0, 0)),
                pl.BlockSpec((1, L_out), lambda i: (0, 0)),
                pl.BlockSpec((rows, L_out), lambda i: (0, 0)),
                pl.BlockSpec((rows, L_out), lambda i: (0, 0)),
            ],
            out_specs=pl.BlockSpec((rows, L_out), lambda i: (i, 0)),
        ),
        # Batch axis is fully independent -> shardable across the 2 TCs on v7x.
        compiler_params=pltpu.CompilerParams(
            dimension_semantics=("parallel",)),
    )(x2d, w1_blk, b1_t, wdw_t, b2_t, m_top, m_bot)

    return out2d.reshape(B, H, W, C_out)


def xception_forward(x_nchw, packed, *, target_rows=256):
    """NCHW wrapper matching the PyTorch module's layout (use the NHWC entry
    point directly to avoid the two layout transposes in a channel-last model)."""
    out_nhwc = xception_forward_nhwc(
        jnp.transpose(x_nchw, (0, 2, 3, 1)), packed, target_rows=target_rows)
    return jnp.transpose(out_nhwc, (0, 3, 1, 2))


def reference_forward(x_nchw, conv1_w, conv1_b, conv2_w, conv2_b):
    """Plain-JAX reference matching torch semantics (for correctness check)."""
    y = jax.lax.conv_general_dilated(
        x_nchw, conv1_w, window_strides=(1, 1), padding="VALID",
        dimension_numbers=("NCHW", "OIHW", "NCHW"))
    y = y + conv1_b[None, :, None, None]
    z = jax.lax.conv_general_dilated(
        y, conv2_w, window_strides=(1, 1), padding=((1, 1), (1, 1)),
        dimension_numbers=("NCHW", "OIHW", "NCHW"),
        feature_group_count=conv2_w.shape[0])
    z = z + conv2_b[None, :, None, None]
    return z


if __name__ == "__main__":
    B, C_in, C_out, H, W = 2, 4, 8, 16, 16

    key = jax.random.PRNGKey(0)
    k1, k2, k3, k4, k5 = jax.random.split(key, 5)
    x = jax.random.normal(k1, (B, C_in, H, W), jnp.float32)
    # Deterministic synthetic parameters (shapes match the torch Conv2d layers).
    conv1_w = 0.1 * jax.random.normal(k2, (C_out, C_in, 1, 1), jnp.float32)
    conv1_b = 0.1 * jax.random.normal(k3, (C_out,), jnp.float32)
    conv2_w = 0.1 * jax.random.normal(k4, (C_out, 1, 3, 3), jnp.float32)  # depthwise
    conv2_b = 0.1 * jax.random.normal(k5, (C_out,), jnp.float32)

    # One-time weight packing, hoisted out of the per-call hot path.
    packed = pack_xception_params(conv1_w, conv1_b, conv2_w, conv2_b, W=W)
    packed = jax.tree_util.tree_map(jax.block_until_ready, packed)

    fwd = jax.jit(xception_forward)
    out = jax.block_until_ready(fwd(x, packed))

    ref = reference_forward(x, conv1_w, conv1_b, conv2_w, conv2_b)
    assert out.shape == ref.shape == (B, C_out, H, W)
    assert jnp.allclose(out, ref, atol=1e-4, rtol=1e-4)
    print("KERNEL_OK")
</pallas_src>

<mosaic_0001>
module attributes {stable_mosaic.version = 11 : i64} {
  func.func @_xception_kernel(%arg0: i32, %arg1: memref<32x64xf32, #tpu.memory_space<vmem>>, %arg2: memref<64x128xf32, #tpu.memory_space<vmem>>, %arg3: memref<1x128xf32, #tpu.memory_space<vmem>>, %arg4: memref<9x128xf32, #tpu.memory_space<vmem>>, %arg5: memref<1x128xf32, #tpu.memory_space<vmem>>, %arg6: memref<32x128xf32, #tpu.memory_space<vmem>>, %arg7: memref<32x128xf32, #tpu.memory_space<vmem>>, %arg8: memref<32x128xf32, #tpu.memory_space<vmem>>) attributes {dimension_semantics = [#tpu.dimension_semantics<parallel>], iteration_bounds = array<i64: 1>, scalar_prefetch = 0 : i64, scratch_operands = 0 : i64, tpu.core_type = #tpu.core_type<tc>, window_params = [{transform_indices = @transform_0, window_bounds = array<i64: 32, 64>}, {pipeline_mode = #tpu.pipeline_mode<synchronous>, transform_indices = @transform_1, window_bounds = array<i64: 64, 128>}, {pipeline_mode = #tpu.pipeline_mode<synchronous>, transform_indices = @transform_2, window_bounds = array<i64: 1, 128>}, {pipeline_mode = #tpu.pipeline_mode<synchronous>, transform_indices = @transform_3, window_bounds = array<i64: 9, 128>}, {pipeline_mode = #tpu.pipeline_mode<synchronous>, transform_indices = @transform_4, window_bounds = array<i64: 1, 128>}, {pipeline_mode = #tpu.pipeline_mode<synchronous>, transform_indices = @transform_5, window_bounds = array<i64: 32, 128>}, {pipeline_mode = #tpu.pipeline_mode<synchronous>, transform_indices = @transform_6, window_bounds = array<i64: 32, 128>}, {transform_indices = @transform_7, window_bounds = array<i64: 32, 128>}]} {
    %c0 = arith.constant 0 : index
    %c0_0 = arith.constant 0 : index
    %0 = vector.load %arg1[%c0, %c0_0] : memref<32x64xf32, #tpu.memory_space<vmem>>, vector<32x64xf32>
    %c0_1 = arith.constant 0 : index
    %c0_2 = arith.constant 0 : index
    %1 = vector.load %arg2[%c0_1, %c0_2] : memref<64x128xf32, #tpu.memory_space<vmem>>, vector<64x128xf32>
    %cst = arith.constant dense<0.000000e+00> : vector<32x128xf32>
    %2 = tpu.matmul %0, %1, %cst {dimension_numbers = #tpu.dot_dimension_numbers<[1], [0], [0], [1], [0, 0, 1, 1], [], []>} : vector<32x64xf32>, vector<64x128xf32>, vector<32x128xf32> -> vector<32x128xf32>
    %c0_3 = arith.constant 0 : index
    %c0_4 = arith.constant 0 : index
    %3 = vector.load %arg3[%c0_3, %c0_4] : memref<1x128xf32, #tpu.memory_space<vmem>>, vector<1x128xf32>
    %4 = vector.broadcast %3 : vector<1x128xf32> to vector<32x128xf32>
    %5 = arith.addf %2, %4 : vector<32x128xf32>
    %c1_i32 = arith.constant 1 : i32
    %6 = tpu.dynamic_rotate %5 by %c1_i32 dim 0 : vector<32x128xf32>, i32 -> vector<32x128xf32>
    %c0_5 = arith.constant 0 : index
    %c0_6 = arith.constant 0 : index
    %7 = vector.load %arg6[%c0_5, %c0_6] : memref<32x128xf32, #tpu.memory_space<vmem>>, vector<32x128xf32>
    %8 = arith.mulf %6, %7 : vector<32x128xf32>
    %c31_i32 = arith.constant 31 : i32
    %9 = tpu.dynamic_rotate %5 by %c31_i32 dim 0 : vector<32x128xf32>, i32 -> vector<32x128xf32>
    %c0_7 = arith.constant 0 : index
    %c0_8 = arith.constant 0 : index
    %10 = vector.load %arg7[%c0_7, %c0_8] : memref<32x128xf32, #tpu.memory_space<vmem>>, vector<32x128xf32>
    %11 = arith.mulf %9, %10 : vector<32x128xf32>
    %c0_9 = arith.constant 0 : index
    %c0_10 = arith.constant 0 : index
    %12 = vector.load %arg4[%c0_9, %c0_10] : memref<9x128xf32, #tpu.memory_space<vmem>>, vector<9x128xf32>
    %13 = vector.extract_strided_slice %12 {offsets = [0, 0], sizes = [1, 128], strides = [1, 1]} : vector<9x128xf32> to vector<1x128xf32>
    %14 = vector.shape_cast %13 : vector<1x128xf32> to vector<128xf32>
    %15 = vector.shape_cast %14 : vector<128xf32> to vector<1x128xf32>
    %16 = vector.broadcast %15 : vector<1x128xf32> to vector<32x128xf32>
    %17 = arith.mulf %8, %16 : vector<32x128xf32>
    %18 = vector.extract_strided_slice %12 {offsets = [3, 0], sizes = [1, 128], strides = [1, 1]} : vector<9x128xf32> to vector<1x128xf32>
    %19 = vector.shape_cast %18 : vector<1x128xf32> to vector<128xf32>
    %20 = vector.shape_cast %19 : vector<128xf32> to vector<1x128xf32>
    %21 = vector.broadcast %20 : vector<1x128xf32> to vector<32x128xf32>
    %22 = arith.mulf %5, %21 : vector<32x128xf32>
    %23 = arith.addf %17, %22 : vector<32x128xf32>
    %24 = vector.extract_strided_slice %12 {offsets = [6, 0], sizes = [1, 128], strides = [1, 1]} : vector<9x128xf32> to vector<1x128xf32>
    %25 = vector.shape_cast %24 : vector<1x128xf32> to vector<128xf32>
    %26 = vector.shape_cast %25 : vector<128xf32> to vector<1x128xf32>
    %27 = vector.broadcast %26 : vector<1x128xf32> to vector<32x128xf32>
    %28 = arith.mulf %11, %27 : vector<32x128xf32>
    %29 = arith.addf %23, %28 : vector<32x128xf32>
    %30 = vector.extract_strided_slice %12 {offsets = [1, 0], sizes = [1, 128], strides = [1, 1]} : vector<9x128xf32> to vector<1x128xf32>
    %31 = vector.shape_cast %30 : vector<1x128xf32> to vector<128xf32>
    %32 = vector.shape_cast %31 : vector<128xf32> to vector<1x128xf32>
    %33 = vector.broadcast %32 : vector<1x128xf32> to vector<32x128xf32>
    %34 = arith.mulf %8, %33 : vector<32x128xf32>
    %35 = vector.extract_strided_slice %12 {offsets = [4, 0], sizes = [1, 128], strides = [1, 1]} : vector<9x128xf32> to vector<1x128xf32>
    %36 = vector.shape_cast %35 : vector<1x128xf32> to vector<128xf32>
    %37 = vector.shape_cast %36 : vector<128xf32> to vector<1x128xf32>
    %38 = vector.broadcast %37 : vector<1x128xf32> to vector<32x128xf32>
    %39 = arith.mulf %5, %38 : vector<32x128xf32>
    %40 = arith.addf %34, %39 : vector<32x128xf32>
    %41 = vector.extract_strided_slice %12 {offsets = [7, 0], sizes = [1, 128], strides = [1, 1]} : vector<9x128xf32> to vector<1x128xf32>
    %42 = vector.shape_cast %41 : vector<1x128xf32> to vector<128xf32>
    %43 = vector.shape_cast %42 : vector<128xf32> to vector<1x128xf32>
    %44 = vector.broadcast %43 : vector<1x128xf32> to vector<32x128xf32>
    %45 = arith.mulf %11, %44 : vector<32x128xf32>
    %46 = arith.addf %40, %45 : vector<32x128xf32>
    %47 = vector.extract_strided_slice %12 {offsets = [2, 0], sizes = [1, 128], strides = [1, 1]} : vector<9x128xf32> to vector<1x128xf32>
    %48 = vector.shape_cast %47 : vector<1x128xf32> to vector<128xf32>
    %49 = vector.shape_cast %48 : vector<128xf32> to vector<1x128xf32>
    %50 = vector.broadcast %49 : vector<1x128xf32> to vector<32x128xf32>
    %51 = arith.mulf %8, %50 : vector<32x128xf32>
    %52 = vector.extract_strided_slice %12 {offsets = [5, 0], sizes = [1, 128], strides = [1, 1]} : vector<9x128xf32> to vector<1x128xf32>
    %53 = vector.shape_cast %52 : vector<1x128xf32> to vector<128xf32>
    %54 = vector.shape_cast %53 : vector<128xf32> to vector<1x128xf32>
    %55 = vector.broadcast %54 : vector<1x128xf32> to vector<32x128xf32>
    %56 = arith.mulf %5, %55 : vector<32x128xf32>
    %57 = arith.addf %51, %56 : vector<32x128xf32>
    %58 = vector.extract_strided_slice %12 {offsets = [8, 0], sizes = [1, 128], strides = [1, 1]} : vector<9x128xf32> to vector<1x128xf32>
    %59 = vector.shape_cast %58 : vector<1x128xf32> to vector<128xf32>
    %60 = vector.shape_cast %59 : vector<128xf32> to vector<1x128xf32>
    %61 = vector.broadcast %60 : vector<1x128xf32> to vector<32x128xf32>
    %62 = arith.mulf %11, %61 : vector<32x128xf32>
    %63 = arith.addf %57, %62 : vector<32x128xf32>
    %c8_i32 = arith.constant 8 : i32
    %64 = tpu.dynamic_rotate %29 by %c8_i32 dim 1 : vector<32x128xf32>, i32 -> vector<32x128xf32>
    %65 = arith.addf %46, %64 : vector<32x128xf32>
    %c120_i32 = arith.constant 120 : i32
    %66 = tpu.dynamic_rotate %63 by %c120_i32 dim 1 : vector<32x128xf32>, i32 -> vector<32x128xf32>
    %67 = arith.addf %65, %66 : vector<32x128xf32>
    %c0_11 = arith.constant 0 : index
    %c0_12 = arith.constant 0 : index
    %68 = vector.load %arg5[%c0_11, %c0_12] : memref<1x128xf32, #tpu.memory_space<vmem>>, vector<1x128xf32>
    %69 = vector.broadcast %68 : vector<1x128xf32> to vector<32x128xf32>
    %70 = arith.addf %67, %69 : vector<32x128xf32>
    %c0_13 = arith.constant 0 : index
    %c0_14 = arith.constant 0 : index
    %71 = vector.load %arg8[%c0_13, %c0_14] : memref<32x128xf32, #tpu.memory_space<vmem>>, vector<32x128xf32>
    tpu.vector_store %arg8[%c0_13, %c0_14], %70 {strides = array<i32>} : memref<32x128xf32, #tpu.memory_space<vmem>>, vector<32x128xf32>,
    return
  }
  func.func @transform_0(%arg0: i32) -> (i32, i32) {
    %c0_i32 = arith.constant 0 : i32
    %c0_i32_0 = arith.constant 0 : i32
    return %arg0, %c0_i32 : i32, i32
  }
  func.func @transform_1(%arg0: i32) -> (i32, i32) {
    %c0_i32 = arith.constant 0 : i32
    %c0_i32_0 = arith.constant 0 : i32
    %c0_i32_1 = arith.constant 0 : i32
    return %c0_i32, %c0_i32_0 : i32, i32
  }
  func.func @transform_2(%arg0: i32) -> (i32, i32) {
    %c0_i32 = arith.constant 0 : i32
    %c0_i32_0 = arith.constant 0 : i32
    %c0_i32_1 = arith.constant 0 : i32
    return %c0_i32, %c0_i32_0 : i32, i32
  }
  func.func @transform_3(%arg0: i32) -> (i32, i32) {
    %c0_i32 = arith.constant 0 : i32
    %c0_i32_0 = arith.constant 0 : i32
    %c0_i32_1 = arith.constant 0 : i32
    return %c0_i32, %c0_i32_0 : i32, i32
  }
  func.func @transform_4(%arg0: i32) -> (i32, i32) {
    %c0_i32 = arith.constant 0 : i32
    %c0_i32_0 = arith.constant 0 : i32
    %c0_i32_1 = arith.constant 0 : i32
    return %c0_i32, %c0_i32_0 : i32, i32
  }
  func.func @transform_5(%arg0: i32) -> (i32, i32) {
    %c0_i32 = arith.constant 0 : i32
    %c0_i32_0 = arith.constant 0 : i32
    %c0_i32_1 = arith.constant 0 : i32
    return %c0_i32, %c0_i32_0 : i32, i32
  }
  func.func @transform_6(%arg0: i32) -> (i32, i32) {
    %c0_i32 = arith.constant 0 : i32
    %c0_i32_0 = arith.constant 0 : i32
    %c0_i32_1 = arith.constant 0 : i32
    return %c0_i32, %c0_i32_0 : i32, i32
  }
  func.func @transform_7(%arg0: i32) -> (i32, i32) {
    %c0_i32 = arith.constant 0 : i32
    %c0_i32_0 = arith.constant 0 : i32
    return %arg0, %c0_i32 : i32, i32
  }
}

</mosaic_0001>

<bundles_post_ra>
// kernel: xception_forward.1
= control target key start
LH: loop header
LB: loop body
LE: loop exit
PB: predicated region body
PF: predicated region fallthrough
CT: control target
= control target key end

     0   :  { %vm42_vm0 = vcmask 523264   ;;  %v88_v12 = vlaneseq  ;;  %s485_s1 = inlined_call_operand.vmem [shape: f32[64,128], index: 1, kind: input, shape index: {}]   ;;  %s486_s2 = inlined_call_operand.vmem [shape: f32[1,128], index: 2, kind: input, shape index: {}]   ;;  %s487_s0 = inlined_call_operand.vmem [shape: f32[32,64], index: 0, kind: input, shape index: {}]   ;;  %s488_s3 = inlined_call_operand.vmem [shape: f32[9,128], index: 3, kind: input, shape index: {}]   ;;  %s489_s4 = inlined_call_operand.vmem [shape: f32[1,128], index: 4, kind: input, shape index: {}]   ;;  %s490_s5 = inlined_call_operand.vmem [shape: f32[32,128], index: 5, kind: input, shape index: {}]   ;;  %s491_s6 = inlined_call_operand.vmem [shape: f32[32,128], index: 6, kind: input, shape index: {}]   ;;  %s492_s7 = inlined_call_operand.vmem [shape: f32[32,128], index: 7, kind: output, shape index: {}]  }
   0x1   :  { %v37_v0 = vld [vmem:[%s485_s1 + $0x38] sm:$0xff]  ;;  %v36_v1 = vld [vmem:[%s485_s1 + $0x30] sm:$0xff]  ;;  %v35_v2 = vld [vmem:[%s485_s1 + $0x28] sm:$0xff] }
   0x2   :  { %236 = vmatpush.msra.mxu2 %v37_v0  ;;  %237 = vmatpush.msra.mxu3 %v37_v0  ;;  %v34_v3 = vld [vmem:[%s485_s1 + $0x20] sm:$0xff]  ;;  %v33_v4 = vld [vmem:[%s485_s1 + $0x18] sm:$0xff]  ;;  %v32_v5 = vld [vmem:[%s485_s1 + $0x10] sm:$0xff]  ;;  %v89_v14 = vshrl.u32 %v88_v12, 7 }
   0x3   :  { %63 = vmatpush.msra.mxu0 %v37_v0  ;;  %235 = vmatpush.msra.mxu1 %v37_v0  ;;  %v31_v6 = vld [vmem:[%s485_s1 + $0x8] sm:$0xff]  ;;  %v30_v7 = vld [vmem:[%s485_s1] sm:$0xff]  ;;  %v28_v8 = vld [vmem:[%s487_s0 + $0x10] sm:$0xff] }
   0x4   :  { %239 = vmatpush.msra.mxu2 %v36_v1  ;;  %240 = vmatpush.msra.mxu3 %v36_v1  ;;  %v29_v9 = vld [vmem:[%s487_s0 + $0x18] sm:$0xff]  ;;  %v26_v10 = vld [vmem:[%s487_s0] sm:$0xff]  ;;  %v27_v11 = vld [vmem:[%s487_s0 + $0x8] sm:$0xff]  ;;  %vm90_vm1 = vcmp.lt.s32.totalorder %v89_v14, 1  ;;  %vm107_vm2 = vcmp.lt.s32.totalorder %v89_v14, 7 }
   0x5   :  { %64 = vmatpush.msra.mxu0 %v36_v1  ;;  %238 = vmatpush.msra.mxu1 %v36_v1  ;;  %v261_v13 = vld [vmem:[%s486_s2] ss:$0 sm:$0xff]  ;;  %v96_v26 = vld [vmem:[%s490_s5 + $0x8] sm:$0xff]  ;;  %v97_v38 = vld [vmem:[%s490_s5 + $0x10] sm:$0xff] }
   0x6   :  { %242 = vmatpush.msra.mxu2 %v35_v2  ;;  %243 = vmatpush.msra.mxu3 %v35_v2  ;;  %v348_v15 = vld [vmem:[%s488_s3] sm:$0xff]  ;;  %v113_v36 = vld [vmem:[%s491_s6 + $0x8] sm:$0xff]  ;;  %v114_v44 = vld [vmem:[%s491_s6 + $0x10] sm:$0xff] }
   0x7   :  { %65 = vmatpush.msra.mxu0 %v35_v2  ;;  %241 = vmatpush.msra.mxu1 %v35_v2  ;;  %v355_v20 = vperm.slane %v348_v15, 4  ;;  %v358_v21 = vperm.slane %v348_v15, 3  ;;  %v122_v30 = vperm.slane %v348_v15, 0  ;;  %v112_v45 = vld [vmem:[%s491_s6] sm:$0xff]  ;;  %v136_v47 = vperm.slane %v348_v15, 6  ;;  %v98_v55 = vld [vmem:[%s490_s5 + $0x18] sm:$0xff] }
   0x8   :  { %245 = vmatpush.msra.mxu2 %v34_v3  ;;  %246 = vmatpush.msra.mxu3 %v34_v3  ;;  %v95_v48 = vld [vmem:[%s490_s5] sm:$0xff]  ;;  %v405_v49 = vperm.slane %v348_v15, 2  ;;  %v408_v50 = vperm.slane %v348_v15, 5  ;;  %v424_v63 = vld [vmem:[%s488_s3 + $0x8] ss:$0 sm:$0xff]  ;;  %s264_s3 = smov 8  }
   0x9   :  { %66 = vmatpush.msra.mxu0 %v34_v3  ;;  %244 = vmatpush.msra.mxu1 %v34_v3 }
   0xa   :  { %248 = vmatpush.msra.mxu2 %v33_v4  ;;  %249 = vmatpush.msra.mxu3 %v33_v4 }
   0xb   :  { %67 = vmatpush.msra.mxu0 %v33_v4  ;;  %247 = vmatpush.msra.mxu1 %v33_v4 }
   0xc   :  { %251 = vmatpush.msra.mxu2 %v32_v5  ;;  %252 = vmatpush.msra.mxu3 %v32_v5 }
   0xd   :  { %68 = vmatpush.msra.mxu0 %v32_v5  ;;  %250 = vmatpush.msra.mxu1 %v32_v5  ;;  %v115_v5 = vld [vmem:[%s491_s6 + $0x18] sm:$0xff]  ;;  %s265_s6 = smov 120  }
   0xe   :  { %254 = vmatpush.msra.mxu2 %v31_v6  ;;  %255 = vmatpush.msra.mxu3 %v31_v6 }
   0xf   :  { %69 = vmatpush.msra.mxu0 %v31_v6  ;;  %253 = vmatpush.msra.mxu1 %v31_v6 }
  0x10   :  { %257 = vmatpush.msra.mxu2 %v30_v7  ;;  %258 = vmatpush.msra.mxu3 %v30_v7 }
  0x11   :  { %70 = vmatpush.msra.mxu0 %v30_v7  ;;  %256 = vmatpush.msra.mxu1 %v30_v7 }
  0x12   :  { %233 = vmatmul.msk.f32.vlgmr.msra.gmra.mxu2 %vm42_vm0, %v28_v8  ;;  %234 = vmatmul.msk.f32.vlgmr.msra.gmra.mxu3 %vm42_vm0, %v29_v9  ;;  %v145_v8 = vperm.slane %v348_v15, 1 }
  0x13   :  { %231 = vmatmul.msk.f32.vlgmr.msra.gmra.mxu0 %vm42_vm0, %v26_v10  ;;  %232 = vmatmul.msk.f32.vlgmr.msra.gmra.mxu1 %vm42_vm0, %v27_v11 }
  0x90   :  { %v72_v16 = vpop.f32.mrf.mxu0  ;;  %v75_v17 = vpop.f32.mrf.mxu1 }
  0x91   :  { %v350_v18 = vadd.f32 %v261_v13, %v72_v16  ;;  %v352_v19 = vadd.f32 %v261_v13, %v75_v17  ;;  %v159_v17 = vperm.slane %v348_v15, 7 }
  0x93   :  { %v84_v22 = vrot.slane %v350_v18, 7  ;;  %v103_v23 = vrot.slane %v350_v18, 1  ;;  %v85_v24 = vrot.slane %v352_v19, 7  ;;  %v104_v25 = vrot.slane %v352_v19, 1 }
  0x94   :  { %v371_v31 = vmul.f32 %v355_v20, %v352_v19  ;;  %v375_v32 = vmul.f32 %v355_v20, %v350_v18  ;;  %v129_v37 = vmul.f32 %v358_v21, %v352_v19  ;;  %v174_v7 = vmul.f32 %v408_v50, %v350_v18 }
  0x95   :  { %v78_v27 = vpop.f32.mrf.mxu2  ;;  %v81_v28 = vpop.f32.mrf.mxu3  ;;  %v93_v29 = vsel %vm90_vm1, %v84_v22, %v85_v24  ;;  %v110_v39 = vsel %vm107_vm2, %v103_v23, %v104_v25 }
  0x96   :  { %v377_v33 = vadd.f32 %v261_v13, %v78_v27  ;;  %v379_v34 = vadd.f32 %v261_v13, %v81_v28  ;;  %v100_v35 = vmul.f32 %v96_v26, %v93_v29  ;;  %v116_v59 = vmul.f32 %v112_v45, %v110_v39 }
  0x97   :  { %v175_v27 = vmul.f32 %v408_v50, %v352_v19 }
  0x98   :  { %v86_v40 = vrot.slane %v377_v33, 7  ;;  %v105_v41 = vrot.slane %v377_v33, 1  ;;  %v87_v42 = vrot.slane %v379_v34, 7  ;;  %v106_v43 = vrot.slane %v379_v34, 1 }
  0x99   :  { %v124_v46 = vmul.f32 %v122_v30, %v100_v35  ;;  %v130_v61 = vmul.f32 %v358_v21, %v377_v33  ;;  %v183_v14 = vmul.f32 %v424_v63, %v116_v59  ;;  %v137_v26 = vmul.f32 %v136_v47, %v116_v59 }
  0x9a   :  { %v109_v51 = vsel %vm107_vm2, %v104_v25, %v105_v41  ;;  %v92_v52 = vsel %vm90_vm1, %v85_v24, %v86_v40  ;;  %v108_v53 = vsel %vm107_vm2, %v105_v41, %v106_v43  ;;  %v94_v54 = vsel %vm90_vm1, %v87_v42, %v84_v22 }
  0x9b   :  { %v117_v56 = vmul.f32 %v113_v36, %v109_v51  ;;  %v101_v57 = vmul.f32 %v97_v38, %v92_v52  ;;  %v417_v58 = vmul.f32 %v114_v44, %v108_v53  ;;  %v133_v60 = vadd.f32 %v129_v37, %v124_v46 }
  0x9c   :  { %v99_v62 = vmul.f32 %v95_v48, %v94_v54  ;;  %v91_v0 = vsel %vm90_vm1, %v86_v40, %v87_v42  ;;  %v111_v4 = vsel %vm107_vm2, %v106_v43, %v103_v23  ;;  %v128_v23 = vmul.f32 %v358_v21, %v350_v18 }
  0x9d   :  { %v138_v1 = vmul.f32 %v136_v47, %v117_v56  ;;  %v125_v2 = vmul.f32 %v122_v30, %v101_v57  ;;  %v102_v3 = vmul.f32 %v98_v55, %v91_v0  ;;  %v139_v11 = vmul.f32 %v136_v47, %v417_v58 }
  0x9e   :  { %v169_v6 = vmul.f32 %v405_v49, %v99_v62  ;;  %v123_v12 = vmul.f32 %v122_v30, %v99_v62  ;;  %v119_v16 = vmul.f32 %v115_v5, %v111_v4  ;;  %v131_v29 = vmul.f32 %v358_v21, %v379_v34 }
  0x9f   :  { %v142_v9 = vadd.f32 %v138_v1, %v133_v60  ;;  %v134_v10 = vadd.f32 %v130_v61, %v125_v2  ;;  %v126_v24 = vmul.f32 %v122_v30, %v102_v3  ;;  %v170_v15 = vmul.f32 %v405_v49, %v100_v35 }
  0xa0   :  { %v178_v13 = vadd.f32 %v174_v7, %v169_v6  ;;  %v132_v28 = vadd.f32 %v128_v23, %v123_v12  ;;  %v184_v36 = vmul.f32 %v424_v63, %v117_v56  ;;  %v140_v18 = vmul.f32 %v136_v47, %v119_v16 }
  0xa1   :  { %193 = vrot.lane.b32.xlu0 %v142_v9, %s264_s3  ;;  %v143_v22 = vadd.f32 %v139_v11, %v134_v10  ;;  %v147_v30 = vmul.f32 %v145_v8, %v100_v35  ;;  %v161_v37 = vmul.f32 %v159_v17, %v117_v56  ;;  %v148_v38 = vmul.f32 %v145_v8, %v101_v57 }
  0xa2   :  { %v187_v25 = vadd.f32 %v183_v14, %v178_v13  ;;  %v135_v39 = vadd.f32 %v131_v29, %v126_v24  ;;  %v171_v19 = vmul.f32 %v405_v49, %v101_v57  ;;  %v153_v40 = vmul.f32 %v355_v20, %v377_v33 }
  0xa3   :  { %195 = vrot.lane.b32.xlu1 %v143_v22, %s264_s3  ;;  %v162_v41 = vmul.f32 %v159_v17, %v417_v58  ;;  %v156_v21 = vadd.f32 %v371_v31, %v147_v30  ;;  %v146_v42 = vmul.f32 %v145_v8, %v99_v62  ;;  %v160_v43 = vmul.f32 %v159_v17, %v116_v59 }
  0xa4   :  { %203 = vrot.lane.b32.xlu2 %v187_v25, %s265_s6  ;;  %v149_v44 = vmul.f32 %v145_v8, %v102_v3  ;;  %v141_v45 = vadd.f32 %v137_v26, %v132_v28  ;;  %v157_v46 = vadd.f32 %v153_v40, %v148_v38  ;;  %v154_v35 = vmul.f32 %v355_v20, %v379_v34 }
  0xa5   :  { %v163_v47 = vmul.f32 %v159_v17, %v119_v16  ;;  %v179_v48 = vadd.f32 %v175_v27, %v170_v15  ;;  %v176_v51 = vmul.f32 %v408_v50, %v377_v33  ;;  %v165_v52 = vadd.f32 %v161_v37, %v156_v21 }
  0xa6   :  { %v155_v53 = vadd.f32 %v375_v32, %v146_v42  ;;  %v144_v54 = vadd.f32 %v140_v18, %v135_v39  ;;  %v172_v31 = vmul.f32 %v405_v49, %v102_v3  ;;  %v166_v55 = vadd.f32 %v162_v41, %v157_v46 }
  0xa7   :  { %v158_v56 = vadd.f32 %v154_v35, %v149_v44  ;;  %v188_v57 = vadd.f32 %v184_v36, %v179_v48  ;;  %v180_v20 = vadd.f32 %v176_v51, %v171_v19  ;;  %v177_v60 = vmul.f32 %v408_v50, %v379_v34  ;;  %v263_v34 = vld [vmem:[%s489_s4] ss:$0 sm:$0xff] }
  0xa8   :  { %v164_v59 = vadd.f32 %v160_v43, %v155_v53  ;;  %v185_v32 = vmul.f32 %v424_v63, %v417_v58  ;;  %v186_v49 = vmul.f32 %v424_v63, %v119_v16 }
  0xa9   :  { %191 = vrot.lane.b32.xlu0 %v141_v45, %s264_s3  ;;  %v167_v61 = vadd.f32 %v163_v47, %v158_v56  ;;  %v181_v33 = vadd.f32 %v177_v60, %v172_v31 }
  0xaa   :  { %v189_v62 = vadd.f32 %v185_v32, %v180_v20 }
  0xab   :  { %197 = vrot.lane.b32.xlu1 %v144_v54, %s264_s3  ;;  %v190_v0 = vadd.f32 %v186_v49, %v181_v33 }
  0xac   :  { %205 = vrot.lane.b32.xlu2 %v188_v57, %s265_s6 }
  0xb1   :  { %207 = vrot.lane.b32.xlu0 %v189_v62, %s265_s6 }
  0xb3   :  { %209 = vrot.lane.b32.xlu1 %v190_v0, %s265_s6 }
  0xfe   :  { %v204_v1 = vpop.permute.xlu2 %203 }
 0x106   :  { %v206_v3 = vpop.permute.xlu2 %205 }
 0x113   :  { %v194_v2 = vpop.permute.xlu0 %193 }
 0x114   :  { %v200_v50 = vadd.f32 %v194_v2, %v165_v52 }
 0x115   :  { %v196_v4 = vpop.permute.xlu1 %195 }
 0x116   :  { %v212_v5 = vadd.f32 %v206_v3, %v200_v50  ;;  %v201_v10 = vadd.f32 %v196_v4, %v166_v55 }
 0x118   :  { %v220_v58 = vadd.f32 %v263_v34, %v212_v5 }
 0x11a   :  { %224 = vst [vmem:[%s492_s7 + $0x8] sm:$0xff] %v220_v58 }
 0x11b   :  { %v192_v63 = vpop.permute.xlu0 %191 }
 0x11c   :  { %v199_v6 = vadd.f32 %v192_v63, %v164_v59 }
 0x11d   :  { %v198_v7 = vpop.permute.xlu1 %197 }
 0x11e   :  { %v211_v8 = vadd.f32 %v204_v1, %v199_v6  ;;  %v202_v12 = vadd.f32 %v198_v7, %v167_v61 }
 0x120   :  { %v219_v9 = vadd.f32 %v263_v34, %v211_v8 }
 0x122   :  { %223 = vst [vmem:[%s492_s7] sm:$0xff] %v219_v9 }
 0x123   :  { %v208_v11 = vpop.permute.xlu0 %207 }
 0x124   :  { %v213_v13 = vadd.f32 %v208_v11, %v201_v10 }
 0x125   :  { %v210_v14 = vpop.permute.xlu1 %209 }
 0x126   :  { %v221_v16 = vadd.f32 %v263_v34, %v213_v13  ;;  %v214_v17 = vadd.f32 %v210_v14, %v202_v12 }
 0x128   :  { %225 = vst [vmem:[%s492_s7 + $0x10] sm:$0xff] %v221_v16  ;;  %v222_v22 = vadd.f32 %v263_v34, %v214_v17 }
 0x12a   :  { %226 = vst [vmem:[%s492_s7 + $0x18] sm:$0xff] %v222_v22 }

</bundles_post_ra>
